<compile_context>
chip_gen: v7x
topology: tpu7x:2x2x1
jax: 0.10.0
libtpu: 0.0.40
codegen_flags: <defaults>
</compile_context>

<pallas_src>
import functools
import math

import jax
import jax.numpy as jnp
from jax.experimental import pallas as pl
from jax.experimental.pallas import tpu as pltpu

# Safe on v5e/v6e (128 MiB physical) and within v7x's 64 MiB per-TC VMEM.
_VMEM_LIMIT_BYTES = 48 * 1024 * 1024


def _divisor_tile(n, target, align=8):
    """Largest multiple of `align` dividing n that is <= target; falls back to n."""
    if n <= target:
        return n
    best = None
    t = align
    while t <= target:
        if n % t == 0:
            best = t
        t += align
    return best if best is not None else n


# ---------------------------------------------------------------------------
# 1) in_proj: x -> q, k, v in head-major (B, H, S, dh) layout.
# ---------------------------------------------------------------------------
def _in_proj_kernel(x_ref, w_ref, b_ref, q_ref, k_ref, v_ref, *, n_heads, d_head):
    x = x_ref[...]                                                  # (tm, D)
    for f, out_ref in enumerate((q_ref, k_ref, v_ref)):
        # Full-width matmul keeps the MXU N dimension filled; per-head column
        # slices are cheap static value slices.
        y = jnp.dot(x, w_ref[f], preferred_element_type=jnp.float32) + b_ref[f]
        for h in range(n_heads):
            col = h * d_head
            out_ref[h] = y[:, col:col + d_head].astype(out_ref.dtype)


def _in_proj(x, w_qkv, b_qkv, *, n_heads, row_tile):
    B, S, D = x.shape
    dh = D // n_heads
    isz = x.dtype.itemsize
    head_shape = jax.ShapeDtypeStruct((B, n_heads, S, dh), x.dtype)
    cost = pl.CostEstimate(
        flops=int(2 * B * S * D * 3 * D),
        transcendentals=0,
        bytes_accessed=int((B * S * D + 3 * D * D + 3 * B * S * D) * isz))
    kernel = functools.partial(_in_proj_kernel, n_heads=n_heads, d_head=dh)
    out_spec = pl.BlockSpec((None, n_heads, row_tile, dh), lambda b, m: (b, 0, m, 0))
    return pl.pallas_call(
        kernel,
        out_shape=(head_shape, head_shape, head_shape),
        grid=(B, S // row_tile),
        in_specs=[
            pl.BlockSpec((None, row_tile, D), lambda b, m: (b, m, 0)),  # x tile
            pl.BlockSpec((3, D, D), lambda b, m: (0, 0, 0)),            # W resident
            pl.BlockSpec((3, 1, D), lambda b, m: (0, 0, 0)),            # bias resident
        ],
        out_specs=(out_spec, out_spec, out_spec),
        compiler_params=pltpu.CompilerParams(
            dimension_semantics=("parallel", "parallel"),
            vmem_limit_bytes=_VMEM_LIMIT_BYTES),
        cost_estimate=cost,
    )(x, w_qkv, b_qkv)


# ---------------------------------------------------------------------------
# 2) Flash attention over (B, H, S, dh); K/V resident per (batch, head),
#    online softmax over in-kernel kv chunks.  Scale already folded into q.
# ---------------------------------------------------------------------------
def _flash_attn_kernel(q_ref, k_ref, v_ref, o_ref, *, kv_chunk, num_kv_chunks):
    q = q_ref[...]                                                  # (tq, dh)
    tq, dh = q.shape

    def body(i, carry):
        m_prev, l_prev, acc_prev = carry
        off = pl.multiple_of(i * kv_chunk, kv_chunk)
        k = k_ref[pl.ds(off, kv_chunk), :]                          # (tk, dh)
        v = v_ref[pl.ds(off, kv_chunk), :]
        # scores (tq, tk) = q @ k^T, f32 accumulation on the MXU.
        s = jax.lax.dot_general(q, k, (((1,), (1,)), ((), ())),
                                preferred_element_type=jnp.float32)
        m_new = jnp.maximum(m_prev, jnp.max(s, axis=-1, keepdims=True))
        alpha = jnp.exp(m_prev - m_new)
        p = jnp.exp(s - m_new)
        l_new = alpha * l_prev + jnp.sum(p, axis=-1, keepdims=True)
        acc_new = alpha * acc_prev + jnp.dot(
            p.astype(v.dtype), v, preferred_element_type=jnp.float32)
        return m_new, l_new, acc_new

    init = (jnp.full((tq, 1), -jnp.inf, jnp.float32),
            jnp.zeros((tq, 1), jnp.float32),
            jnp.zeros((tq, dh), jnp.float32))
    _, l_fin, acc_fin = jax.lax.fori_loop(0, num_kv_chunks, body, init)
    # EUP approximate reciprocal (~1e-3-level relative error, covered by the
    # test tolerance); switch approx=False if callers need tighter accuracy.
    o_ref[...] = (acc_fin * pl.reciprocal(l_fin, approx=True)).astype(o_ref.dtype)


def _flash_attention(q, k, v, *, q_tile, kv_chunk):
    B, H, S, dh = q.shape
    assert S % q_tile == 0 and S % kv_chunk == 0
    isz = q.dtype.itemsize
    cost = pl.CostEstimate(
        flops=int(4 * B * H * S * S * dh),
        transcendentals=int(B * H * S * S),
        bytes_accessed=int(4 * B * H * S * dh * isz))
    kernel = functools.partial(_flash_attn_kernel, kv_chunk=kv_chunk,
                               num_kv_chunks=S // kv_chunk)
    # TODO(synk): fall back to a kv grid axis when S*dh per head is too large for VMEM.
    return pl.pallas_call(
        kernel,
        out_shape=jax.ShapeDtypeStruct((B, H, S, dh), q.dtype),
        grid=(B, H, S // q_tile),
        in_specs=[
            pl.BlockSpec((None, None, q_tile, dh), lambda b, h, i: (b, h, i, 0)),
            # K and V stay resident per (batch, head): DMA'd from HBM exactly once.
            pl.BlockSpec((None, None, S, dh), lambda b, h, i: (b, h, 0, 0)),
            pl.BlockSpec((None, None, S, dh), lambda b, h, i: (b, h, 0, 0)),
        ],
        out_specs=pl.BlockSpec((None, None, q_tile, dh), lambda b, h, i: (b, h, i, 0)),
        compiler_params=pltpu.CompilerParams(
            dimension_semantics=("parallel", "parallel", "parallel"),
            vmem_limit_bytes=_VMEM_LIMIT_BYTES),
        cost_estimate=cost,
    )(q, k, v)


# ---------------------------------------------------------------------------
# 3) out_proj with the head merge folded in: out = sum_h attn_h @ W_h + b.
# ---------------------------------------------------------------------------
def _out_proj_kernel(a_ref, w_ref, b_ref, o_ref, *, n_heads):
    acc = jnp.dot(a_ref[0], w_ref[0], preferred_element_type=jnp.float32)
    for h in range(1, n_heads):
        acc = acc + jnp.dot(a_ref[h], w_ref[h], preferred_element_type=jnp.float32)
    o_ref[...] = (acc + b_ref[...]).astype(o_ref.dtype)


def _out_proj(attn, w_o, b_o, *, out_dtype, row_tile):
    B, H, S, dh = attn.shape
    D = H * dh
    isz = attn.dtype.itemsize
    cost = pl.CostEstimate(
        flops=int(2 * B * S * D * D),
        transcendentals=0,
        bytes_accessed=int((2 * B * S * D + D * D) * isz))
    kernel = functools.partial(_out_proj_kernel, n_heads=H)
    return pl.pallas_call(
        kernel,
        out_shape=jax.ShapeDtypeStruct((B, S, D), out_dtype),
        grid=(B, S // row_tile),
        in_specs=[
            pl.BlockSpec((None, H, row_tile, dh), lambda b, m: (b, 0, m, 0)),  # attn
            pl.BlockSpec((H, dh, D), lambda b, m: (0, 0, 0)),                  # W resident
            pl.BlockSpec((1, D), lambda b, m: (0, 0)),                         # bias
        ],
        out_specs=pl.BlockSpec((None, row_tile, D), lambda b, m: (b, m, 0)),
        compiler_params=pltpu.CompilerParams(
            dimension_semantics=("parallel", "parallel"),
            vmem_limit_bytes=_VMEM_LIMIT_BYTES),
        cost_estimate=cost,
    )(attn, w_o, b_o)


# ---------------------------------------------------------------------------
# Parameter preprocessing (done once, offline) + full forward.
# ---------------------------------------------------------------------------
def prepare_params(w_in, b_in, w_out, b_out, *, n_heads, compute_dtype=jnp.float32):
    """PyTorch nn.Linear params -> kernel-layout params.

    w_in: (3D, D), b_in: (3D,), w_out: (D, D), b_out: (D,).
    Returns (w_qkv, b_qkv, w_o, b_o):
      w_qkv: (3, D, D)  with the q columns pre-scaled by 1/sqrt(dh)
      b_qkv: (3, 1, D)  float32 (added to the f32 accumulator)
      w_o  : (H, dh, D) per-head slices of W_out^T
      b_o  : (1, D)     float32
    """
    three_d, D = w_in.shape
    assert three_d == 3 * D and D % n_heads == 0
    dh = D // n_heads
    scale = 1.0 / math.sqrt(dh)

    w_in_t = jnp.asarray(w_in, jnp.float32).T            # (D, 3D): cols = [q | k | v]
    b_in_f = jnp.asarray(b_in, jnp.float32)
    col_scale = jnp.concatenate([jnp.full((D,), scale, jnp.float32),
                                 jnp.ones((2 * D,), jnp.float32)])
    w_in_t = w_in_t * col_scale[None, :]
    b_in_f = b_in_f * col_scale

    w_qkv = w_in_t.reshape(D, 3, D).transpose(1, 0, 2).astype(compute_dtype)
    b_qkv = b_in_f.reshape(3, 1, D)
    w_o = jnp.asarray(w_out, jnp.float32).T.reshape(n_heads, dh, D).astype(compute_dtype)
    b_o = jnp.asarray(b_out, jnp.float32).reshape(1, D)
    return w_qkv, b_qkv, w_o, b_o


def self_attention(x, w_qkv, b_qkv, w_o, b_o, *, n_heads,
                   row_tile=None, q_tile=None, kv_chunk=None):
    """x: (B, S, D) -> (B, S, D).  Params from prepare_params()."""
    B, S, D = x.shape
    assert D % n_heads == 0
    tm = row_tile if row_tile is not None else _divisor_tile(S, 512)
    tq = q_tile if q_tile is not None else _divisor_tile(S, 512)
    tk = kv_chunk if kv_chunk is not None else _divisor_tile(S, 512)
    assert S % tm == 0 and S % tq == 0 and S % tk == 0

    q, k, v = _in_proj(x, w_qkv, b_qkv, n_heads=n_heads, row_tile=tm)   # (B,H,S,dh) x3
    attn = _flash_attention(q, k, v, q_tile=tq, kv_chunk=tk)            # (B,H,S,dh)
    return _out_proj(attn, w_o, b_o, out_dtype=x.dtype, row_tile=tm)    # (B,S,D)


# ---------------------------------------------------------------------------
# Pure-JAX reference mirroring the PyTorch forward (non-causal path).
# ---------------------------------------------------------------------------
def _reference(x, w_in, b_in, w_out, b_out, n_heads):
    B, S, D = x.shape
    dh = D // n_heads
    qkv = x @ w_in.T + b_in
    q, k, v = jnp.split(qkv, 3, axis=-1)
    q = q.reshape(B, S, n_heads, dh).transpose(0, 2, 1, 3)
    k = k.reshape(B, S, n_heads, dh).transpose(0, 2, 1, 3)
    v = v.reshape(B, S, n_heads, dh).transpose(0, 2, 1, 3)
    w = (q @ jnp.swapaxes(k, -1, -2)) / math.sqrt(dh)
    w = jax.nn.softmax(w, axis=-1)
    out = (w @ v).transpose(0, 2, 1, 3).reshape(B, S, D)
    return out @ w_out.T + b_out


def _run_case(key, *, B, S, D, H, dtype, atol, rtol, tiles=None):
    kx, kw1, kb1, kw2, kb2 = jax.random.split(key, 5)
    bound = 1.0 / math.sqrt(D)
    x = jax.random.normal(kx, (B, S, D), dtype=jnp.float32)
    w_in = jax.random.uniform(kw1, (3 * D, D), minval=-bound, maxval=bound)
    b_in = jax.random.uniform(kb1, (3 * D,), minval=-bound, maxval=bound)
    w_out = jax.random.uniform(kw2, (D, D), minval=-bound, maxval=bound)
    b_out = jax.random.uniform(kb2, (D,), minval=-bound, maxval=bound)

    params = prepare_params(w_in, b_in, w_out, b_out, n_heads=H, compute_dtype=dtype)
    x_in = x.astype(dtype)
    tiles = tiles or {}

    fwd = jax.jit(self_attention,
                  static_argnames=("n_heads", "row_tile", "q_tile", "kv_chunk"))
    out = jax.block_until_ready(fwd(x_in, *params, n_heads=H, **tiles))

    with jax.default_matmul_precision("highest"):
        ref = _reference(x_in.astype(jnp.float32), w_in, b_in, w_out, b_out, H)

    assert out.shape == (B, S, D)
    out_f32 = out.astype(jnp.float32)
    err = float(jnp.max(jnp.abs(out_f32 - ref)))
    assert jnp.allclose(out_f32, ref, atol=atol, rtol=rtol), (
        f"mismatch vs reference (B={B}, S={S}, D={D}, H={H}, dtype={dtype}): "
        f"max abs err {err}")


if __name__ == "__main__":
    key = jax.random.PRNGKey(0)
    k1, k2, k3 = jax.random.split(key, 3)

    # Small shapes consistent with the module (batch=2, seq=8, d_embed=32, heads=4).
    _run_case(k1, B=2, S=8, D=32, H=4, dtype=jnp.float32, atol=5e-3, rtol=5e-3)

    # Exercises multiple q tiles and the in-kernel kv loop (4 chunks).
    _run_case(k2, B=1, S=512, D=64, H=2, dtype=jnp.float32, atol=5e-3, rtol=5e-3,
              tiles=dict(row_tile=128, q_tile=128, kv_chunk=128))

    # bf16 compute path (bf16 MXU operands / storage, f32 accumulation).
    _run_case(k3, B=1, S=128, D=64, H=4, dtype=jnp.bfloat16, atol=5e-2, rtol=5e-2)

    print("KERNEL_OK")
</pallas_src>

<mosaic_0001>
module attributes {stable_mosaic.version = 11 : i64} {
  func.func @_flash_attn_kernel(%arg0: i32, %arg1: i32, %arg2: i32, %arg3: memref<1x1x8x8xf32, #tpu.memory_space<vmem>>, %arg4: memref<1x1x8x8xf32, #tpu.memory_space<vmem>>, %arg5: memref<1x1x8x8xf32, #tpu.memory_space<vmem>>, %arg6: memref<1x1x8x8xf32, #tpu.memory_space<vmem>>) attributes {dimension_semantics = [#tpu.dimension_semantics<parallel>, #tpu.dimension_semantics<parallel>, #tpu.dimension_semantics<parallel>], iteration_bounds = array<i64: 2, 4, 1>, scalar_prefetch = 0 : i64, scratch_operands = 0 : i64, tpu.core_type = #tpu.core_type<tc>, window_params = [{transform_indices = @transform_0, window_bounds = array<i64: 1, 1, 8, 8>}, {transform_indices = @transform_1, window_bounds = array<i64: 1, 1, 8, 8>}, {transform_indices = @transform_2, window_bounds = array<i64: 1, 1, 8, 8>}, {transform_indices = @transform_3, window_bounds = array<i64: 1, 1, 8, 8>}]} {
    %c0 = arith.constant 0 : index
    %c0_0 = arith.constant 0 : index
    %c0_1 = arith.constant 0 : index
    %c0_2 = arith.constant 0 : index
    %0 = vector.load %arg3[%c0, %c0_0, %c0_1, %c0_2] : memref<1x1x8x8xf32, #tpu.memory_space<vmem>>, vector<1x1x8x8xf32>
    %1 = vector.shape_cast %0 : vector<1x1x8x8xf32> to vector<8x8xf32>
    %cst = arith.constant 0xFF800000 : f32
    %2 = vector.broadcast %cst : f32 to vector<8x1xf32>
    %cst_3 = arith.constant 0.000000e+00 : f32
    %3 = vector.broadcast %cst_3 : f32 to vector<8x1xf32>
    %cst_4 = arith.constant 0.000000e+00 : f32
    %4 = vector.broadcast %cst_4 : f32 to vector<8x8xf32>
    %c0_i32 = arith.constant 0 : i32
    %c8_i32 = arith.constant 8 : i32
    %5 = arith.muli %c0_i32, %c8_i32 : i32
    %6 = tpu.assume_multiple %5, 8 : i32
    %c0_5 = arith.constant 0 : index
    %c0_6 = arith.constant 0 : index
    %7 = arith.index_cast %6 : i32 to index
    %c0_7 = arith.constant 0 : index
    %8 = vector.load %arg4[%c0_5, %c0_6, %7, %c0_7] : memref<1x1x8x8xf32, #tpu.memory_space<vmem>>, vector<1x1x8x8xf32>
    %9 = vector.shape_cast %8 : vector<1x1x8x8xf32> to vector<8x8xf32>
    %c0_8 = arith.constant 0 : index
    %c0_9 = arith.constant 0 : index
    %10 = arith.index_cast %6 : i32 to index
    %c0_10 = arith.constant 0 : index
    %11 = vector.load %arg5[%c0_8, %c0_9, %10, %c0_10] : memref<1x1x8x8xf32, #tpu.memory_space<vmem>>, vector<1x1x8x8xf32>
    %12 = vector.shape_cast %11 : vector<1x1x8x8xf32> to vector<8x8xf32>
    %cst_11 = arith.constant dense<0.000000e+00> : vector<8x8xf32>
    %13 = tpu.matmul %1, %9, %cst_11 {dimension_numbers = #tpu.dot_dimension_numbers<[1], [1], [0], [0], [0, 0, 1, 0], [], []>} : vector<8x8xf32>, vector<8x8xf32>, vector<8x8xf32> -> vector<8x8xf32>
    %cst_12 = arith.constant dense<0xFF800000> : vector<8xf32>
    %14 = vector.multi_reduction <maximumf>, %13, %cst_12 [1] : vector<8x8xf32> to vector<8xf32>
    %15 = vector.shape_cast %14 : vector<8xf32> to vector<8x1xf32>
    %16 = arith.maximumf %2, %15 : vector<8x1xf32>
    %17 = arith.subf %2, %16 : vector<8x1xf32>
    %18 = math.exp %17 : vector<8x1xf32>
    %19 = vector.broadcast %16 : vector<8x1xf32> to vector<8x8xf32>
    %20 = arith.subf %13, %19 : vector<8x8xf32>
    %21 = math.exp %20 : vector<8x8xf32>
    %22 = arith.mulf %18, %3 : vector<8x1xf32>
    %cst_13 = arith.constant dense<0.000000e+00> : vector<8xf32>
    %23 = vector.multi_reduction <add>, %21, %cst_13 [1] : vector<8x8xf32> to vector<8xf32>
    %24 = vector.shape_cast %23 : vector<8xf32> to vector<8x1xf32>
    %25 = arith.addf %22, %24 : vector<8x1xf32>
    %26 = vector.broadcast %18 : vector<8x1xf32> to vector<8x8xf32>
    %27 = arith.mulf %26, %4 : vector<8x8xf32>
    %cst_14 = arith.constant dense<0.000000e+00> : vector<8x8xf32>
    %28 = tpu.matmul %21, %12, %cst_14 {dimension_numbers = #tpu.dot_dimension_numbers<[1], [0], [0], [1], [0, 0, 1, 1], [], []>} : vector<8x8xf32>, vector<8x8xf32>, vector<8x8xf32> -> vector<8x8xf32>
    %29 = arith.addf %27, %28 : vector<8x8xf32>
    %c1_i32 = arith.constant 1 : i32
    %30 = tpu.reciprocal %25 {approx = true} : vector<8x1xf32> -> vector<8x1xf32>
    %31 = vector.broadcast %30 : vector<8x1xf32> to vector<8x8xf32>
    %32 = arith.mulf %29, %31 : vector<8x8xf32>
    %c0_15 = arith.constant 0 : index
    %c0_16 = arith.constant 0 : index
    %c0_17 = arith.constant 0 : index
    %c0_18 = arith.constant 0 : index
    %33 = vector.load %arg6[%c0_15, %c0_16, %c0_17, %c0_18] : memref<1x1x8x8xf32, #tpu.memory_space<vmem>>, vector<1x1x8x8xf32>
    %34 = vector.shape_cast %33 : vector<1x1x8x8xf32> to vector<8x8xf32>
    %35 = vector.shape_cast %32 : vector<8x8xf32> to vector<1x1x8x8xf32>
    tpu.vector_store %arg6[%c0_15, %c0_16, %c0_17, %c0_18], %35 {strides = array<i32>} : memref<1x1x8x8xf32, #tpu.memory_space<vmem>>, vector<1x1x8x8xf32>,
    return
  }
  func.func @transform_0(%arg0: i32, %arg1: i32, %arg2: i32) -> (i32, i32, i32, i32) {
    %c0_i32 = arith.constant 0 : i32
    %c0_i32_0 = arith.constant 0 : i32
    return %arg0, %arg1, %arg2, %c0_i32 : i32, i32, i32, i32
  }
  func.func @transform_1(%arg0: i32, %arg1: i32, %arg2: i32) -> (i32, i32, i32, i32) {
    %c0_i32 = arith.constant 0 : i32
    %c0_i32_0 = arith.constant 0 : i32
    %c0_i32_1 = arith.constant 0 : i32
    return %arg0, %arg1, %c0_i32, %c0_i32_0 : i32, i32, i32, i32
  }
  func.func @transform_2(%arg0: i32, %arg1: i32, %arg2: i32) -> (i32, i32, i32, i32) {
    %c0_i32 = arith.constant 0 : i32
    %c0_i32_0 = arith.constant 0 : i32
    %c0_i32_1 = arith.constant 0 : i32
    return %arg0, %arg1, %c0_i32, %c0_i32_0 : i32, i32, i32, i32
  }
  func.func @transform_3(%arg0: i32, %arg1: i32, %arg2: i32) -> (i32, i32, i32, i32) {
    %c0_i32 = arith.constant 0 : i32
    %c0_i32_0 = arith.constant 0 : i32
    return %arg0, %arg1, %arg2, %c0_i32 : i32, i32, i32, i32
  }
}

module attributes {stable_mosaic.version = 11 : i64} {
  func.func @_out_proj_kernel(%arg0: i32, %arg1: i32, %arg2: memref<1x4x8x8xf32, #tpu.memory_space<vmem>>, %arg3: memref<4x8x32xf32, #tpu.memory_space<vmem>>, %arg4: memref<1x32xf32, #tpu.memory_space<vmem>>, %arg5: memref<1x8x32xf32, #tpu.memory_space<vmem>>) attributes {dimension_semantics = [#tpu.dimension_semantics<parallel>, #tpu.dimension_semantics<parallel>], iteration_bounds = array<i64: 2, 1>, scalar_prefetch = 0 : i64, scratch_operands = 0 : i64, tpu.core_type = #tpu.core_type<tc>, window_params = [{transform_indices = @transform_0, window_bounds = array<i64: 1, 4, 8, 8>}, {pipeline_mode = #tpu.pipeline_mode<synchronous>, transform_indices = @transform_1, window_bounds = array<i64: 4, 8, 32>}, {pipeline_mode = #tpu.pipeline_mode<synchronous>, transform_indices = @transform_2, window_bounds = array<i64: 1, 32>}, {transform_indices = @transform_3, window_bounds = array<i64: 1, 8, 32>}]} {
    %c0 = arith.constant 0 : index
    %c0_0 = arith.constant 0 : index
    %c0_1 = arith.constant 0 : index
    %c0_2 = arith.constant 0 : index
    %0 = vector.load %arg2[%c0, %c0_0, %c0_1, %c0_2] : memref<1x4x8x8xf32, #tpu.memory_space<vmem>>, vector<1x1x8x8xf32>
    %1 = vector.shape_cast %0 : vector<1x1x8x8xf32> to vector<8x8xf32>
    %c0_3 = arith.constant 0 : index
    %c0_4 = arith.constant 0 : index
    %c0_5 = arith.constant 0 : index
    %2 = vector.load %arg3[%c0_3, %c0_4, %c0_5] : memref<4x8x32xf32, #tpu.memory_space<vmem>>, vector<1x8x32xf32>
    %3 = vector.shape_cast %2 : vector<1x8x32xf32> to vector<8x32xf32>
    %cst = arith.constant dense<0.000000e+00> : vector<8x32xf32>
    %4 = tpu.matmul %1, %3, %cst {dimension_numbers = #tpu.dot_dimension_numbers<[1], [0], [0], [1], [0, 0, 1, 1], [], []>} : vector<8x8xf32>, vector<8x32xf32>, vector<8x32xf32> -> vector<8x32xf32>
    %c0_6 = arith.constant 0 : index
    %c1 = arith.constant 1 : index
    %c0_7 = arith.constant 0 : index
    %c0_8 = arith.constant 0 : index
    %5 = vector.load %arg2[%c0_6, %c1, %c0_7, %c0_8] : memref<1x4x8x8xf32, #tpu.memory_space<vmem>>, vector<1x1x8x8xf32>
    %6 = vector.shape_cast %5 : vector<1x1x8x8xf32> to vector<8x8xf32>
    %c1_9 = arith.constant 1 : index
    %c0_10 = arith.constant 0 : index
    %c0_11 = arith.constant 0 : index
    %7 = vector.load %arg3[%c1_9, %c0_10, %c0_11] : memref<4x8x32xf32, #tpu.memory_space<vmem>>, vector<1x8x32xf32>
    %8 = vector.shape_cast %7 : vector<1x8x32xf32> to vector<8x32xf32>
    %cst_12 = arith.constant dense<0.000000e+00> : vector<8x32xf32>
    %9 = tpu.matmul %6, %8, %cst_12 {dimension_numbers = #tpu.dot_dimension_numbers<[1], [0], [0], [1], [0, 0, 1, 1], [], []>} : vector<8x8xf32>, vector<8x32xf32>, vector<8x32xf32> -> vector<8x32xf32>
    %10 = arith.addf %4, %9 : vector<8x32xf32>
    %c0_13 = arith.constant 0 : index
    %c2 = arith.constant 2 : index
    %c0_14 = arith.constant 0 : index
    %c0_15 = arith.constant 0 : index
    %11 = vector.load %arg2[%c0_13, %c2, %c0_14, %c0_15] : memref<1x4x8x8xf32, #tpu.memory_space<vmem>>, vector<1x1x8x8xf32>
    %12 = vector.shape_cast %11 : vector<1x1x8x8xf32> to vector<8x8xf32>
    %c2_16 = arith.constant 2 : index
    %c0_17 = arith.constant 0 : index
    %c0_18 = arith.constant 0 : index
    %13 = vector.load %arg3[%c2_16, %c0_17, %c0_18] : memref<4x8x32xf32, #tpu.memory_space<vmem>>, vector<1x8x32xf32>
    %14 = vector.shape_cast %13 : vector<1x8x32xf32> to vector<8x32xf32>
    %cst_19 = arith.constant dense<0.000000e+00> : vector<8x32xf32>
    %15 = tpu.matmul %12, %14, %cst_19 {dimension_numbers = #tpu.dot_dimension_numbers<[1], [0], [0], [1], [0, 0, 1, 1], [], []>} : vector<8x8xf32>, vector<8x32xf32>, vector<8x32xf32> -> vector<8x32xf32>
    %16 = arith.addf %10, %15 : vector<8x32xf32>
    %c0_20 = arith.constant 0 : index
    %c3 = arith.constant 3 : index
    %c0_21 = arith.constant 0 : index
    %c0_22 = arith.constant 0 : index
    %17 = vector.load %arg2[%c0_20, %c3, %c0_21, %c0_22] : memref<1x4x8x8xf32, #tpu.memory_space<vmem>>, vector<1x1x8x8xf32>
    %18 = vector.shape_cast %17 : vector<1x1x8x8xf32> to vector<8x8xf32>
    %c3_23 = arith.constant 3 : index
    %c0_24 = arith.constant 0 : index
    %c0_25 = arith.constant 0 : index
    %19 = vector.load %arg3[%c3_23, %c0_24, %c0_25] : memref<4x8x32xf32, #tpu.memory_space<vmem>>, vector<1x8x32xf32>
    %20 = vector.shape_cast %19 : vector<1x8x32xf32> to vector<8x32xf32>
    %cst_26 = arith.constant dense<0.000000e+00> : vector<8x32xf32>
    %21 = tpu.matmul %18, %20, %cst_26 {dimension_numbers = #tpu.dot_dimension_numbers<[1], [0], [0], [1], [0, 0, 1, 1], [], []>} : vector<8x8xf32>, vector<8x32xf32>, vector<8x32xf32> -> vector<8x32xf32>
    %22 = arith.addf %16, %21 : vector<8x32xf32>
    %c0_27 = arith.constant 0 : index
    %c0_28 = arith.constant 0 : index
    %23 = vector.load %arg4[%c0_27, %c0_28] : memref<1x32xf32, #tpu.memory_space<vmem>>, vector<1x32xf32>
    %24 = vector.broadcast %23 : vector<1x32xf32> to vector<8x32xf32>
    %25 = arith.addf %22, %24 : vector<8x32xf32>
    %c0_29 = arith.constant 0 : index
    %c0_30 = arith.constant 0 : index
    %c0_31 = arith.constant 0 : index
    %26 = vector.load %arg5[%c0_29, %c0_30, %c0_31] : memref<1x8x32xf32, #tpu.memory_space<vmem>>, vector<1x8x32xf32>
    %27 = vector.shape_cast %26 : vector<1x8x32xf32> to vector<8x32xf32>
    %28 = vector.shape_cast %25 : vector<8x32xf32> to vector<1x8x32xf32>
    tpu.vector_store %arg5[%c0_29, %c0_30, %c0_31], %28 {strides = array<i32>} : memref<1x8x32xf32, #tpu.memory_space<vmem>>, vector<1x8x32xf32>,
    return
  }
  func.func @transform_0(%arg0: i32, %arg1: i32) -> (i32, i32, i32, i32) {
    %c0_i32 = arith.constant 0 : i32
    %c0_i32_0 = arith.constant 0 : i32
    %c0_i32_1 = arith.constant 0 : i32
    return %arg0, %c0_i32, %arg1, %c0_i32_0 : i32, i32, i32, i32
  }
  func.func @transform_1(%arg0: i32, %arg1: i32) -> (i32, i32, i32) {
    %c0_i32 = arith.constant 0 : i32
    %c0_i32_0 = arith.constant 0 : i32
    %c0_i32_1 = arith.constant 0 : i32
    %c0_i32_2 = arith.constant 0 : i32
    return %c0_i32, %c0_i32_0, %c0_i32_1 : i32, i32, i32
  }
  func.func @transform_2(%arg0: i32, %arg1: i32) -> (i32, i32) {
    %c0_i32 = arith.constant 0 : i32
    %c0_i32_0 = arith.constant 0 : i32
    %c0_i32_1 = arith.constant 0 : i32
    return %c0_i32, %c0_i32_0 : i32, i32
  }
  func.func @transform_3(%arg0: i32, %arg1: i32) -> (i32, i32, i32) {
    %c0_i32 = arith.constant 0 : i32
    %c0_i32_0 = arith.constant 0 : i32
    return %arg0, %arg1, %c0_i32 : i32, i32, i32
  }
}

module attributes {stable_mosaic.version = 11 : i64} {
  func.func @_in_proj_kernel(%arg0: i32, %arg1: i32, %arg2: memref<1x8x32xf32, #tpu.memory_space<vmem>>, %arg3: memref<3x32x32xf32, #tpu.memory_space<vmem>>, %arg4: memref<3x1x32xf32, #tpu.memory_space<vmem>>, %arg5: memref<1x4x8x8xf32, #tpu.memory_space<vmem>>, %arg6: memref<1x4x8x8xf32, #tpu.memory_space<vmem>>, %arg7: memref<1x4x8x8xf32, #tpu.memory_space<vmem>>) attributes {dimension_semantics = [#tpu.dimension_semantics<parallel>, #tpu.dimension_semantics<parallel>], iteration_bounds = array<i64: 2, 1>, scalar_prefetch = 0 : i64, scratch_operands = 0 : i64, tpu.core_type = #tpu.core_type<tc>, window_params = [{transform_indices = @transform_0, window_bounds = array<i64: 1, 8, 32>}, {pipeline_mode = #tpu.pipeline_mode<synchronous>, transform_indices = @transform_1, window_bounds = array<i64: 3, 32, 32>}, {pipeline_mode = #tpu.pipeline_mode<synchronous>, transform_indices = @transform_2, window_bounds = array<i64: 3, 1, 32>}, {transform_indices = @transform_3, window_bounds = array<i64: 1, 4, 8, 8>}, {transform_indices = @transform_4, window_bounds = array<i64: 1, 4, 8, 8>}, {transform_indices = @transform_5, window_bounds = array<i64: 1, 4, 8, 8>}]} {
    %c0 = arith.constant 0 : index
    %c0_0 = arith.constant 0 : index
    %c0_1 = arith.constant 0 : index
    %0 = vector.load %arg2[%c0, %c0_0, %c0_1] : memref<1x8x32xf32, #tpu.memory_space<vmem>>, vector<1x8x32xf32>
    %1 = vector.shape_cast %0 : vector<1x8x32xf32> to vector<8x32xf32>
    %c0_2 = arith.constant 0 : index
    %c0_3 = arith.constant 0 : index
    %c0_4 = arith.constant 0 : index
    %2 = vector.load %arg3[%c0_2, %c0_3, %c0_4] : memref<3x32x32xf32, #tpu.memory_space<vmem>>, vector<1x32x32xf32>
    %3 = vector.shape_cast %2 : vector<1x32x32xf32> to vector<32x32xf32>
    %cst = arith.constant dense<0.000000e+00> : vector<8x32xf32>
    %4 = tpu.matmul %1, %3, %cst {dimension_numbers = #tpu.dot_dimension_numbers<[1], [0], [0], [1], [0, 0, 1, 1], [], []>} : vector<8x32xf32>, vector<32x32xf32>, vector<8x32xf32> -> vector<8x32xf32>
    %c0_5 = arith.constant 0 : index
    %c0_6 = arith.constant 0 : index
    %c0_7 = arith.constant 0 : index
    %5 = vector.load %arg4[%c0_5, %c0_6, %c0_7] : memref<3x1x32xf32, #tpu.memory_space<vmem>>, vector<1x1x32xf32>
    %6 = vector.shape_cast %5 : vector<1x1x32xf32> to vector<1x32xf32>
    %7 = vector.broadcast %6 : vector<1x32xf32> to vector<8x32xf32>
    %8 = arith.addf %4, %7 : vector<8x32xf32>
    %9 = vector.extract_strided_slice %8 {offsets = [0, 0], sizes = [8, 8], strides = [1, 1]} : vector<8x32xf32> to vector<8x8xf32>
    %c0_8 = arith.constant 0 : index
    %c0_9 = arith.constant 0 : index
    %c0_10 = arith.constant 0 : index
    %c0_11 = arith.constant 0 : index
    %10 = vector.load %arg5[%c0_8, %c0_9, %c0_10, %c0_11] : memref<1x4x8x8xf32, #tpu.memory_space<vmem>>, vector<1x1x8x8xf32>
    %11 = vector.shape_cast %10 : vector<1x1x8x8xf32> to vector<8x8xf32>
    %12 = vector.shape_cast %9 : vector<8x8xf32> to vector<1x1x8x8xf32>
    tpu.vector_store %arg5[%c0_8, %c0_9, %c0_10, %c0_11], %12 {strides = array<i32>} : memref<1x4x8x8xf32, #tpu.memory_space<vmem>>, vector<1x1x8x8xf32>,
    %13 = vector.extract_strided_slice %8 {offsets = [0, 8], sizes = [8, 8], strides = [1, 1]} : vector<8x32xf32> to vector<8x8xf32>
    %c0_12 = arith.constant 0 : index
    %c1 = arith.constant 1 : index
    %c0_13 = arith.constant 0 : index
    %c0_14 = arith.constant 0 : index
    %14 = vector.load %arg5[%c0_12, %c1, %c0_13, %c0_14] : memref<1x4x8x8xf32, #tpu.memory_space<vmem>>, vector<1x1x8x8xf32>
    %15 = vector.shape_cast %14 : vector<1x1x8x8xf32> to vector<8x8xf32>
    %16 = vector.shape_cast %13 : vector<8x8xf32> to vector<1x1x8x8xf32>
    tpu.vector_store %arg5[%c0_12, %c1, %c0_13, %c0_14], %16 {strides = array<i32>} : memref<1x4x8x8xf32, #tpu.memory_space<vmem>>, vector<1x1x8x8xf32>,
    %17 = vector.extract_strided_slice %8 {offsets = [0, 16], sizes = [8, 8], strides = [1, 1]} : vector<8x32xf32> to vector<8x8xf32>
    %c0_15 = arith.constant 0 : index
    %c2 = arith.constant 2 : index
    %c0_16 = arith.constant 0 : index
    %c0_17 = arith.constant 0 : index
    %18 = vector.load %arg5[%c0_15, %c2, %c0_16, %c0_17] : memref<1x4x8x8xf32, #tpu.memory_space<vmem>>, vector<1x1x8x8xf32>
    %19 = vector.shape_cast %18 : vector<1x1x8x8xf32> to vector<8x8xf32>
    %20 = vector.shape_cast %17 : vector<8x8xf32> to vector<1x1x8x8xf32>
    tpu.vector_store %arg5[%c0_15, %c2, %c0_16, %c0_17], %20 {strides = array<i32>} : memref<1x4x8x8xf32, #tpu.memory_space<vmem>>, vector<1x1x8x8xf32>,
    %21 = vector.extract_strided_slice %8 {offsets = [0, 24], sizes = [8, 8], strides = [1, 1]} : vector<8x32xf32> to vector<8x8xf32>
    %c0_18 = arith.constant 0 : index
    %c3 = arith.constant 3 : index
    %c0_19 = arith.constant 0 : index
    %c0_20 = arith.constant 0 : index
    %22 = vector.load %arg5[%c0_18, %c3, %c0_19, %c0_20] : memref<1x4x8x8xf32, #tpu.memory_space<vmem>>, vector<1x1x8x8xf32>
    %23 = vector.shape_cast %22 : vector<1x1x8x8xf32> to vector<8x8xf32>
    %24 = vector.shape_cast %21 : vector<8x8xf32> to vector<1x1x8x8xf32>
    tpu.vector_store %arg5[%c0_18, %c3, %c0_19, %c0_20], %24 {strides = array<i32>} : memref<1x4x8x8xf32, #tpu.memory_space<vmem>>, vector<1x1x8x8xf32>,
    %c1_21 = arith.constant 1 : index
    %c0_22 = arith.constant 0 : index
    %c0_23 = arith.constant 0 : index
    %25 = vector.load %arg3[%c1_21, %c0_22, %c0_23] : memref<3x32x32xf32, #tpu.memory_space<vmem>>, vector<1x32x32xf32>
    %26 = vector.shape_cast %25 : vector<1x32x32xf32> to vector<32x32xf32>
    %cst_24 = arith.constant dense<0.000000e+00> : vector<8x32xf32>
    %27 = tpu.matmul %1, %26, %cst_24 {dimension_numbers = #tpu.dot_dimension_numbers<[1], [0], [0], [1], [0, 0, 1, 1], [], []>} : vector<8x32xf32>, vector<32x32xf32>, vector<8x32xf32> -> vector<8x32xf32>
    %c1_25 = arith.constant 1 : index
    %c0_26 = arith.constant 0 : index
    %c0_27 = arith.constant 0 : index
    %28 = vector.load %arg4[%c1_25, %c0_26, %c0_27] : memref<3x1x32xf32, #tpu.memory_space<vmem>>, vector<1x1x32xf32>
    %29 = vector.shape_cast %28 : vector<1x1x32xf32> to vector<1x32xf32>
    %30 = vector.broadcast %29 : vector<1x32xf32> to vector<8x32xf32>
    %31 = arith.addf %27, %30 : vector<8x32xf32>
    %32 = vector.extract_strided_slice %31 {offsets = [0, 0], sizes = [8, 8], strides = [1, 1]} : vector<8x32xf32> to vector<8x8xf32>
    %c0_28 = arith.constant 0 : index
    %c0_29 = arith.constant 0 : index
    %c0_30 = arith.constant 0 : index
    %c0_31 = arith.constant 0 : index
    %33 = vector.load %arg6[%c0_28, %c0_29, %c0_30, %c0_31] : memref<1x4x8x8xf32, #tpu.memory_space<vmem>>, vector<1x1x8x8xf32>
    %34 = vector.shape_cast %33 : vector<1x1x8x8xf32> to vector<8x8xf32>
    %35 = vector.shape_cast %32 : vector<8x8xf32> to vector<1x1x8x8xf32>
    tpu.vector_store %arg6[%c0_28, %c0_29, %c0_30, %c0_31], %35 {strides = array<i32>} : memref<1x4x8x8xf32, #tpu.memory_space<vmem>>, vector<1x1x8x8xf32>,
    %36 = vector.extract_strided_slice %31 {offsets = [0, 8], sizes = [8, 8], strides = [1, 1]} : vector<8x32xf32> to vector<8x8xf32>
    %c0_32 = arith.constant 0 : index
    %c1_33 = arith.constant 1 : index
    %c0_34 = arith.constant 0 : index
    %c0_35 = arith.constant 0 : index
    %37 = vector.load %arg6[%c0_32, %c1_33, %c0_34, %c0_35] : memref<1x4x8x8xf32, #tpu.memory_space<vmem>>, vector<1x1x8x8xf32>
    %38 = vector.shape_cast %37 : vector<1x1x8x8xf32> to vector<8x8xf32>
    %39 = vector.shape_cast %36 : vector<8x8xf32> to vector<1x1x8x8xf32>
    tpu.vector_store %arg6[%c0_32, %c1_33, %c0_34, %c0_35], %39 {strides = array<i32>} : memref<1x4x8x8xf32, #tpu.memory_space<vmem>>, vector<1x1x8x8xf32>,
    %40 = vector.extract_strided_slice %31 {offsets = [0, 16], sizes = [8, 8], strides = [1, 1]} : vector<8x32xf32> to vector<8x8xf32>
    %c0_36 = arith.constant 0 : index
    %c2_37 = arith.constant 2 : index
    %c0_38 = arith.constant 0 : index
    %c0_39 = arith.constant 0 : index
    %41 = vector.load %arg6[%c0_36, %c2_37, %c0_38, %c0_39] : memref<1x4x8x8xf32, #tpu.memory_space<vmem>>, vector<1x1x8x8xf32>
    %42 = vector.shape_cast %41 : vector<1x1x8x8xf32> to vector<8x8xf32>
    %43 = vector.shape_cast %40 : vector<8x8xf32> to vector<1x1x8x8xf32>
    tpu.vector_store %arg6[%c0_36, %c2_37, %c0_38, %c0_39], %43 {strides = array<i32>} : memref<1x4x8x8xf32, #tpu.memory_space<vmem>>, vector<1x1x8x8xf32>,
    %44 = vector.extract_strided_slice %31 {offsets = [0, 24], sizes = [8, 8], strides = [1, 1]} : vector<8x32xf32> to vector<8x8xf32>
    %c0_40 = arith.constant 0 : index
    %c3_41 = arith.constant 3 : index
    %c0_42 = arith.constant 0 : index
    %c0_43 = arith.constant 0 : index
    %45 = vector.load %arg6[%c0_40, %c3_41, %c0_42, %c0_43] : memref<1x4x8x8xf32, #tpu.memory_space<vmem>>, vector<1x1x8x8xf32>
    %46 = vector.shape_cast %45 : vector<1x1x8x8xf32> to vector<8x8xf32>
    %47 = vector.shape_cast %44 : vector<8x8xf32> to vector<1x1x8x8xf32>
    tpu.vector_store %arg6[%c0_40, %c3_41, %c0_42, %c0_43], %47 {strides = array<i32>} : memref<1x4x8x8xf32, #tpu.memory_space<vmem>>, vector<1x1x8x8xf32>,
    %c2_44 = arith.constant 2 : index
    %c0_45 = arith.constant 0 : index
    %c0_46 = arith.constant 0 : index
    %48 = vector.load %arg3[%c2_44, %c0_45, %c0_46] : memref<3x32x32xf32, #tpu.memory_space<vmem>>, vector<1x32x32xf32>
    %49 = vector.shape_cast %48 : vector<1x32x32xf32> to vector<32x32xf32>
    %cst_47 = arith.constant dense<0.000000e+00> : vector<8x32xf32>
    %50 = tpu.matmul %1, %49, %cst_47 {dimension_numbers = #tpu.dot_dimension_numbers<[1], [0], [0], [1], [0, 0, 1, 1], [], []>} : vector<8x32xf32>, vector<32x32xf32>, vector<8x32xf32> -> vector<8x32xf32>
    %c2_48 = arith.constant 2 : index
    %c0_49 = arith.constant 0 : index
    %c0_50 = arith.constant 0 : index
    %51 = vector.load %arg4[%c2_48, %c0_49, %c0_50] : memref<3x1x32xf32, #tpu.memory_space<vmem>>, vector<1x1x32xf32>
    %52 = vector.shape_cast %51 : vector<1x1x32xf32> to vector<1x32xf32>
    %53 = vector.broadcast %52 : vector<1x32xf32> to vector<8x32xf32>
    %54 = arith.addf %50, %53 : vector<8x32xf32>
    %55 = vector.extract_strided_slice %54 {offsets = [0, 0], sizes = [8, 8], strides = [1, 1]} : vector<8x32xf32> to vector<8x8xf32>
    %c0_51 = arith.constant 0 : index
    %c0_52 = arith.constant 0 : index
    %c0_53 = arith.constant 0 : index
    %c0_54 = arith.constant 0 : index
    %56 = vector.load %arg7[%c0_51, %c0_52, %c0_53, %c0_54] : memref<1x4x8x8xf32, #tpu.memory_space<vmem>>, vector<1x1x8x8xf32>
    %57 = vector.shape_cast %56 : vector<1x1x8x8xf32> to vector<8x8xf32>
    %58 = vector.shape_cast %55 : vector<8x8xf32> to vector<1x1x8x8xf32>
    tpu.vector_store %arg7[%c0_51, %c0_52, %c0_53, %c0_54], %58 {strides = array<i32>} : memref<1x4x8x8xf32, #tpu.memory_space<vmem>>, vector<1x1x8x8xf32>,
    %59 = vector.extract_strided_slice %54 {offsets = [0, 8], sizes = [8, 8], strides = [1, 1]} : vector<8x32xf32> to vector<8x8xf32>
    %c0_55 = arith.constant 0 : index
    %c1_56 = arith.constant 1 : index
    %c0_57 = arith.constant 0 : index
    %c0_58 = arith.constant 0 : index
    %60 = vector.load %arg7[%c0_55, %c1_56, %c0_57, %c0_58] : memref<1x4x8x8xf32, #tpu.memory_space<vmem>>, vector<1x1x8x8xf32>
    %61 = vector.shape_cast %60 : vector<1x1x8x8xf32> to vector<8x8xf32>
    %62 = vector.shape_cast %59 : vector<8x8xf32> to vector<1x1x8x8xf32>
    tpu.vector_store %arg7[%c0_55, %c1_56, %c0_57, %c0_58], %62 {strides = array<i32>} : memref<1x4x8x8xf32, #tpu.memory_space<vmem>>, vector<1x1x8x8xf32>,
    %63 = vector.extract_strided_slice %54 {offsets = [0, 16], sizes = [8, 8], strides = [1, 1]} : vector<8x32xf32> to vector<8x8xf32>
    %c0_59 = arith.constant 0 : index
    %c2_60 = arith.constant 2 : index
    %c0_61 = arith.constant 0 : index
    %c0_62 = arith.constant 0 : index
    %64 = vector.load %arg7[%c0_59, %c2_60, %c0_61, %c0_62] : memref<1x4x8x8xf32, #tpu.memory_space<vmem>>, vector<1x1x8x8xf32>
    %65 = vector.shape_cast %64 : vector<1x1x8x8xf32> to vector<8x8xf32>
    %66 = vector.shape_cast %63 : vector<8x8xf32> to vector<1x1x8x8xf32>
    tpu.vector_store %arg7[%c0_59, %c2_60, %c0_61, %c0_62], %66 {strides = array<i32>} : memref<1x4x8x8xf32, #tpu.memory_space<vmem>>, vector<1x1x8x8xf32>,
    %67 = vector.extract_strided_slice %54 {offsets = [0, 24], sizes = [8, 8], strides = [1, 1]} : vector<8x32xf32> to vector<8x8xf32>
    %c0_63 = arith.constant 0 : index
    %c3_64 = arith.constant 3 : index
    %c0_65 = arith.constant 0 : index
    %c0_66 = arith.constant 0 : index
    %68 = vector.load %arg7[%c0_63, %c3_64, %c0_65, %c0_66] : memref<1x4x8x8xf32, #tpu.memory_space<vmem>>, vector<1x1x8x8xf32>
    %69 = vector.shape_cast %68 : vector<1x1x8x8xf32> to vector<8x8xf32>
    %70 = vector.shape_cast %67 : vector<8x8xf32> to vector<1x1x8x8xf32>
    tpu.vector_store %arg7[%c0_63, %c3_64, %c0_65, %c0_66], %70 {strides = array<i32>} : memref<1x4x8x8xf32, #tpu.memory_space<vmem>>, vector<1x1x8x8xf32>,
    return
  }
  func.func @transform_0(%arg0: i32, %arg1: i32) -> (i32, i32, i32) {
    %c0_i32 = arith.constant 0 : i32
    %c0_i32_0 = arith.constant 0 : i32
    return %arg0, %arg1, %c0_i32 : i32, i32, i32
  }
  func.func @transform_1(%arg0: i32, %arg1: i32) -> (i32, i32, i32) {
    %c0_i32 = arith.constant 0 : i32
    %c0_i32_0 = arith.constant 0 : i32
    %c0_i32_1 = arith.constant 0 : i32
    %c0_i32_2 = arith.constant 0 : i32
    return %c0_i32, %c0_i32_0, %c0_i32_1 : i32, i32, i32
  }
  func.func @transform_2(%arg0: i32, %arg1: i32) -> (i32, i32, i32) {
    %c0_i32 = arith.constant 0 : i32
    %c0_i32_0 = arith.constant 0 : i32
    %c0_i32_1 = arith.constant 0 : i32
    %c0_i32_2 = arith.constant 0 : i32
    return %c0_i32, %c0_i32_0, %c0_i32_1 : i32, i32, i32
  }
  func.func @transform_3(%arg0: i32, %arg1: i32) -> (i32, i32, i32, i32) {
    %c0_i32 = arith.constant 0 : i32
    %c0_i32_0 = arith.constant 0 : i32
    %c0_i32_1 = arith.constant 0 : i32
    return %arg0, %c0_i32, %arg1, %c0_i32_0 : i32, i32, i32, i32
  }
  func.func @transform_4(%arg0: i32, %arg1: i32) -> (i32, i32, i32, i32) {
    %c0_i32 = arith.constant 0 : i32
    %c0_i32_0 = arith.constant 0 : i32
    %c0_i32_1 = arith.constant 0 : i32
    return %arg0, %c0_i32, %arg1, %c0_i32_0 : i32, i32, i32, i32
  }
  func.func @transform_5(%arg0: i32, %arg1: i32) -> (i32, i32, i32, i32) {
    %c0_i32 = arith.constant 0 : i32
    %c0_i32_0 = arith.constant 0 : i32
    %c0_i32_1 = arith.constant 0 : i32
    return %arg0, %c0_i32, %arg1, %c0_i32_0 : i32, i32, i32, i32
  }
}

</mosaic_0001>

<bundles_post_ra>
// kernel: self_attention.3
= control target key start
LH: loop header
LB: loop body
LE: loop exit
PB: predicated region body
PF: predicated region fallthrough
CT: control target
= control target key end

     0   :  { %11 = vsyncpa [#allocation3], 0  ;;  %s1353_s0 = inlined_call_operand.hbm [shape: f32[2,8,32], index: 0, kind: input, shape index: {}]   ;;  %s1354_s1 = inlined_call_operand.hbm [shape: f32[3,32,32], index: 1, kind: input, shape index: {}]   ;;  %s1355_s2 = inlined_call_operand.vmem [shape: f32[3,1,32], index: 2, kind: input, shape index: {}]   ;;  %s1356_s3 = inlined_call_operand.vmem [shape: f32[2,4,8,8], index: 3, kind: output, shape index: {0}]   ;;  %s1357_s4 = inlined_call_operand.vmem [shape: f32[2,4,8,8], index: 4, kind: output, shape index: {1}]   ;;  %s1358_s5 = inlined_call_operand.vmem [shape: f32[2,4,8,8], index: 5, kind: output, shape index: {2}]  }
   0x1   :  { %13 = vsyncpa [#allocation3 + $0x1], 0 }
   0x2   :  { %14 = vsyncpa [#allocation5], 0  ;;  %s1151_s18 = smov 0   ;;  %s1153_s19 = smov 0  }
   0x3   :  { %s1155_s20 = smov 0   ;;  %s1157_s21 = smov 0  }
   0x4   :  { %s1159_s22 = smov 0   ;;  %s1161_s23 = smov 0  }
   0x5 LB: > { %s819_s24 = sadd.s32 4294967295, %s1109_s23   ;;  %p54_p0 = scmp.ne.s32.totalorder %s1093_s19, %s1089_s18  ;;  %s1109_s23 = sphi %s1161_s23, %s20_s23   ;;  %s1105_s22 = sphi %s1159_s22, %s1375_s22   ;;  %s1101_s21 = sphi %s1157_s21, %s1374_s21   ;;  %s1097_s20 = sphi %s1155_s20, %s1373_s20   ;;  %s1093_s19 = sphi %s1153_s19, %s1372_s19   ;;  %s1089_s18 = sphi %s1151_s18, %s1371_s18  }
   0x6   : > { %p1181_p1 = scmp.eq.s32.totalorder %s819_s24, 0  ;;  %p821_p2 = scmp.ge.s32.totalorder %s1109_s23, 1 }
   0x7   : > { %p191_p3 = scmp.lt.s32.totalorder %s1109_s23, 3  ;;  %s1111_s28 = smov [#allocation4]  }
   0x8   : > { %s1363_s25 = scalar_select %p1181_p1, 1, 0 }
   0x9   : > { %p1189_p4 = por %p1181_p1, %p54_p0  ;;  %p1193_p5 = pnand %p821_p2, %p191_p3 }
   0xa   : > { %s203_s29 = sshll.u32 %s1111_s28, 4  ;;  %s32_s6 = sadd.s32 1, %s1105_s22  ;;  %s204_s29 = int_to_ptr.vmem [resolvable:$true] %s203_s29 }
   0xb   : > { %s1364_s26 = scalar_select %p1189_p4, 1, 0 }
   0xc   : > { %s1365_s27 = scalar_select %p1193_p5, 1, 0 }
   0xd   : > { %p929_p6 = pneg %p1193_p5  ;;  %s997_s9 = scalar_lea.hbm %s1354_s1, 1536 }
   0xe   : > { %p998_p8 = scmp.ne.s32.totalorder %s1354_s1, %s997_s9  ;;  %p1004_p12 = scmp.lt.u32.totalorder %s997_s9, %s1354_s1 }
   0xf   : > { %p1201_p7 = pnand %p929_p6, %p1181_p1 }
  0x11   : > { %p999_p9 = pneg %p1201_p7 }
  0x13   : > { %p1000_p10 = pnand %p999_p9, %p998_p8 }
  0x15   : > { %p1001_p11 = pneg %p1000_p10 }
  0x17   : > { %p1006_p13 = pnand %p1004_p12, %p1001_p11 }
  0x19   : > { %1009 = shalt.err (!%p1006_p13)
}
  0x1a   : > { %s1010_s14 = scalar_lea.vmem %s204_s29, 1536  ;;  %p1018_p6 = scmp.lt.s32.totalorder %s204_s29, %s204_s29 }
  0x1b   : > { %p1011_p0 = scmp.ne.s32.totalorder %s204_s29, %s1010_s14  ;;  %p1019_p1 = scmp.lt.s32.totalorder %s1010_s14, %s1010_s14 }
  0x1d   : > { %p1013_p2 = pnand %p1011_p0, %p999_p9  ;;  %p1020_p4 = por %p1019_p1, %p1018_p6 }
  0x1f   : > { %p1014_p3 = pneg %p1013_p2 }
  0x21   : > { %p1021_p5 = pnand %p1020_p4, %p1014_p3 }
  0x23   : > { %1024 = shalt.err (!%p1021_p5)
}
  0x24   : > { %s1112_s15 = smov 128   ;;  %s1113_s16 = smov 8  }
  0x25   : > { %932 = dma.hbm_to_vmem [thread:$0]  (!%p1201_p7), %s1354_s1, 1536, %s204_s29, [#allocation5], %s1112_s15, %s1112_s15, %s1113_s16  }
  0x26   : > { %p34_p1 = scmp.ge.s32.totalorder %s32_s6, 2  ;;  %s41_s24 = sadd.s32 1, %s1097_s20 }
  0x27   : > { %p48_p4 = scmp.ne.s32.totalorder %s1097_s20, %s1093_s19  ;;  %p49_p5 = scmp.eq.s32.totalorder %s1109_s23, 0 }
  0x28   : > { %s1377_s6 = smov (%p34_p1, %s32_s6), 0  ;;  %p938_p9 = scmp.lt.s32.totalorder %s1109_s23, 2 }
  0x29   : > { %p50_p8 = por %p49_p5, %p48_p4  ;;  %s36_s28 = ssub.s32 %s1105_s22, %s1377_s6 }
  0x2a   : > { %s220_s7 = sand.u32 1, %s1097_s20   ;;  %p39_p10 = scmp.eq.s32.totalorder %s36_s28, 0 }
  0x2b   : > { %s824_s8 = sshll.u32 %s220_s7, 3  ;;  %s825_s9 = sshll.u32 %s1105_s22, 7 }
  0x2c   : > { %s1234_s10 = scalar_select %p39_p10, %s1097_s20, %s41_s24  }
  0x2d   : > { %s1239_s29 = scalar_lea.hbm %s1353_s0, %s825_s9  ;;  %s224_s12 = scalar_lea.vmem [#allocation2], %s824_s8 }
  0x2e   : > { %s232_s13 = sshll.u32 %s224_s12, 4  ;;  %p1241_p7 = pnand %p938_p9, %p50_p8  ;;  %s1245_s13 = int_to_ptr.vmem [resolvable:$true] %s232_s13 }
  0x2f   : > { %s221_s15 = scalar_lea.sflag [#allocation3], %s220_s7  ;;  %s1025_s16 = scalar_lea.hbm %s1239_s29, 128 }
  0x30   : > { %p1026_p11 = scmp.ne.s32.totalorder %s1239_s29, %s1025_s16  ;;  %p1027_p12 = pneg %p1241_p7 }
  0x31   : > { %s1030_s24 = scalar_lea.hbm %s1353_s0, 256  ;;  %p1031_p2 = scmp.lt.u32.totalorder %s1239_s29, %s1353_s0 }
  0x32   : > { %p1028_p13 = pnand %p1027_p12, %p1026_p11  ;;  %p1032_p3 = scmp.lt.u32.totalorder %s1030_s24, %s1025_s16 }
  0x33   : > { %p1034_p1 = scmp.lt.u32.totalorder %s1025_s16, %s1239_s29 }
  0x34   : > { %p1029_p0 = pneg %p1028_p13  ;;  %p1033_p6 = por %p1032_p3, %p1031_p2 }
  0x36   : > { %p1035_p4 = por %p1034_p1, %p1033_p6 }
  0x38   : > { %p1036_p5 = pnand %p1035_p4, %p1029_p0 }
  0x3a   : > { %1039 = shalt.err (!%p1036_p5)
}
  0x3b   : > { %s1040_s7 = scalar_lea.vmem %s1245_s13, 128  ;;  %s1114_s9 = smov [#allocation2]  }
  0x3c   : > { %p1041_p8 = scmp.ne.s32.totalorder %s1245_s13, %s1040_s7  ;;  %s1045_s30 = sshll.u32 %s1114_s9, 4  ;;  %s1046_s30 = int_to_ptr.vmem [resolvable:$false] %s1045_s30 }
  0x3d   : > { %s1047_s11 = scalar_lea.vmem %s1046_s30, 256  ;;  %p1048_p11 = scmp.lt.s32.totalorder %s1245_s13, %s1046_s30 }
  0x3e   : > { %p1043_p9 = pnand %p1041_p8, %p1027_p12  ;;  %p1049_p13 = scmp.lt.s32.totalorder %s1047_s11, %s1040_s7 }
  0x40   : > { %p1044_p10 = pneg %p1043_p9  ;;  %p1050_p2 = por %p1049_p13, %p1048_p11 }
  0x42   : > { %p1051_p3 = pnand %p1050_p2, %p1044_p10 }
  0x44   : > { %1054 = shalt.err (!%p1051_p3)
}
  0x45   : > { %936 = dma.hbm_to_vmem [thread:$0]  (!%p1241_p7), %s1239_s29, 128, %s1245_s13, %s221_s15  }
  0x46   : > { %p1368_p0 = scmp.ne.s32.totalorder %s1365_s27, 0 }
  0x47   : > { %s243_s12 = sand.u32 (!%p1368_p0), 1, %s1093_s19   ;;  %p1369_p12 = scmp.ne.s32.totalorder (!%p1368_p0), %s1364_s26, 0 }
  0x48   : > { %241 = sbr.rel (%p1368_p0) target bundleno = 440 (0x1b8), region = 32  ;;  %s1275_s16 = sshll.u32 (!%p1368_p0), %s243_s12, 3 }
  0x49   : > { %s244_s17 = scalar_lea.sflag (!%p1368_p0), [#allocation3], %s243_s12  ;;  %s247_s18 = scalar_lea.vmem (!%p1368_p0), [#allocation2], %s1275_s16 }
  0x4f   : > { %1080 = dma.done.wait (%p1369_p12), %s244_s17, 128  }
  0x50   : > { %1082 = vsyncadd (%p1369_p12), %s244_s17, 4294967168  ;;  %p1370_p6 = scmp.ne.s32.totalorder %s1363_s25, 0 }
  0x52   : > { %1084 = dma.done.wait (%p1370_p6), [#allocation5], 1536  }
  0x53   : > { %1086 = vsyncadd (%p1370_p6), [#allocation5], 4294965760  ;;  %v1115_v0 = vmov 0.0|0.0   ;;  %vm1116_vm0 = vmmov 0   ;;  %v1117_v1 = vmov 0.0   ;;  %v322_v2 = vld [vmem:[#allocation4] sm:$0xff] }
  0x54   : > { %905 = vmatprep.subr.bf16.mxu0 %v1115_v0  ;;  %911 = vmatprep.subr.bf16.mxu1 %v1115_v0  ;;  %v323_v3 = vld [vmem:[#allocation4 + $0x8] sm:$0xff]  ;;  %v324_v4 = vld [vmem:[#allocation4 + $0x10] sm:$0xff]  ;;  %v325_v6 = vld [vmem:[#allocation4 + $0x18] sm:$0xff]  ;;  %vm333_vm1 = vcmask 261120   ;;  %p297_p7 = scmp.lt.s32.totalorder %s1101_s21, 1  ;;  %vm407_vm2 = vcmask 64512  }
  0x55   : > { %880 = vmatprep.mubr.msk.f32.mxu0 %vm1116_vm0, %v1117_v1  ;;  %891 = vmatprep.mubr.msk.f32.mxu1 %vm1116_vm0, %v1117_v1  ;;  %v906_v5 = vpack.c.bf16 %v323_v3, %v322_v2  ;;  %v426_v7 = vld [vmem:[#allocation4 + $0x20] sm:$0xff]  ;;  %v427_v8 = vld [vmem:[#allocation4 + $0x28] sm:$0xff]  ;;  %v428_v10 = vld [vmem:[#allocation4 + $0x30] sm:$0xff]  ;;  %v909_v12 = vpack.c.bf16 %v325_v6, %v324_v4  ;;  %s1118_s7 = smov 104   ;;  %s1119_s9 = smov 120  }
  0x56   : > { %v912_v9 = vpack.c.bf16 %v427_v8, %v426_v7  ;;  %v429_v11 = vld [vmem:[#allocation4 + $0x38] sm:$0xff]  ;;  %v526_v14 = vld [vmem:[#allocation4 + $0x40] sm:$0xff]  ;;  %v527_v15 = vld [vmem:[#allocation4 + $0x48] sm:$0xff]  ;;  %s1379_s21 = smov (!%p297_p7, %s1101_s21), 1  ;;  %s1120_s12 = smov 112  }
  0x57   : > { %907 = vmatpush3.bf16.msra.mxu0 %v906_v5  ;;  %v915_v13 = vpack.c.bf16 %v429_v11, %v428_v10  ;;  %v321_v16 = vld [vmem:[%s247_s18] sm:$0xff]  ;;  %v918_v17 = vpack.c.bf16 %v527_v15, %v526_v14  ;;  %s854_s25 = sshll.u32 %s1379_s21, 5 }
  0x58   : > { %908 = vmatprep.subr.bf16.mxu0 %v1115_v0  ;;  %913 = vmatpush3.bf16.msra.mxu1 %v912_v9  ;;  %v528_v18 = vld [vmem:[#allocation4 + $0x50] sm:$0xff]  ;;  %v529_v19 = vld [vmem:[#allocation4 + $0x58] sm:$0xff]  ;;  %s1302_s24 = scalar_lea.vmem %s1356_s3, %s854_s25  ;;  %s1307_s8 = scalar_lea.vmem %s1357_s4, %s854_s25 }
  0x59   : > { %914 = vmatprep.subr.bf16.mxu1 %v1115_v0  ;;  %v921_v20 = vpack.c.bf16 %v529_v19, %v528_v18  ;;  %v835_v21 = vld [vmem:[%s1355_s2] ss:$0 sm:$0xff]  ;;  %v841_v22 = vld [vmem:[%s1355_s2 + $0x1] ss:$0 sm:$0xff]  ;;  %v847_v29 = vld [vmem:[%s1355_s2 + $0x2] ss:$0 sm:$0xff]  ;;  %s320_s18 = scalar_lea.vmem %s1358_s5, %s854_s25 }
  0x5b   : > { %910 = vmatpush3.bf16.msra.mxu0 %v909_v12 }
  0x5c   : > { %916 = vmatpush3.bf16.msra.mxu1 %v915_v13  ;;  %917 = vmatprep.subr.bf16.mxu0 %v1115_v0 }
  0x5e   : > { %881 = vmatmul.mubr.msk.f32.vlgmr.msra.gmra.mrb[0].mxu0 %vm333_vm1, %v321_v16 }
  0x5f   : > { %892 = vmatmul.mubr.msk.f32.vlgmr.msra.gmra.mrb[0].mxu1 %vm333_vm1, %v321_v16  ;;  %919 = vmatpush3.bf16.msra.mxu0 %v918_v17 }
  0x60   : > { %920 = vmatprep.subr.bf16.mxu0 %v1115_v0  ;;  %902 = vmatprep.mubr.msk.f32.mxu0 %vm1116_vm0, %v1117_v1 }
  0x63   : > { %922 = vmatpush3.bf16.msra.mxu0 %v921_v20 }
  0x66   : > { %903 = vmatmul.mubr.msk.f32.vlgmr.msra.gmra.mrb[2].mxu0 %vm333_vm1, %v321_v16 }
 0x131   : > { %v403_v23 = vpop.f32.mrb[0].mxu0 }
 0x132   : > { %v404_v24 = vadd.f32 %v835_v21, %v403_v23  ;;  %v882_v25 = vpop.f32.mrb[1].mxu0  ;;  %v504_v26 = vpop.f32.mrb[0].mxu1 }
 0x133   : > { %v505_v27 = vadd.f32 %v841_v22, %v504_v26  ;;  %v893_v28 = vpop.f32.mrb[1].mxu1 }
 0x134   : > { %420 = vrot.lane.b32.xlu1 %v404_v24, %s1118_s7  ;;  %410 = vrot.lane.b32.xlu0 %v404_v24, %s1119_s9  ;;  %408 = vst.msk [vmem:[%s1302_s24] sm:$0xff] %vm407_vm2, %v404_v24 }
 0x135   : > { %508 = vst.msk [vmem:[%s1307_s8] sm:$0xff] %vm407_vm2, %v505_v27 }
 0x138   : > { %510 = vrot.lane.b32.xlu1 %v505_v27, %s1119_s9  ;;  %415 = vrot.lane.b32.xlu0 %v404_v24, %s1120_s12 }
 0x139   : > { %v604_v30 = vpop.f32.mrb[2].mxu0 }
 0x13a   : > { %v605_v31 = vadd.f32 %v847_v29, %v604_v30  ;;  %v904_v32 = vpop.f32.mrb[3].mxu0 }
 0x13c   : > { %520 = vrot.lane.b32.xlu1 %v505_v27, %s1118_s7  ;;  %515 = vrot.lane.b32.xlu0 %v505_v27, %s1120_s12  ;;  %608 = vst.msk [vmem:[%s320_s18] sm:$0xff] %vm407_vm2, %v605_v31 }
 0x140   : > { %615 = vrot.lane.b32.xlu1 %v605_v31, %s1120_s12  ;;  %610 = vrot.lane.b32.xlu0 %v605_v31, %s1119_s9 }
 0x144   : > { %620 = vrot.lane.b32.xlu0 %v605_v31, %s1118_s7 }
 0x1a6   : > { %v421_v33 = vpop.permute.xlu1 %420  ;;  %v411_v34 = vpop.permute.xlu0 %410 }
 0x1a7   : > { %839 = vst.msk [vmem:[%s1302_s24 + $0x18] sm:$0xff] %vm407_vm2, %v421_v33  ;;  %837 = vst.msk [vmem:[%s1302_s24 + $0x8] sm:$0xff] %vm407_vm2, %v411_v34 }
 0x1aa   : > { %v511_v35 = vpop.permute.xlu1 %510  ;;  %v416_v36 = vpop.permute.xlu0 %415 }
 0x1ab   : > { %843 = vst.msk [vmem:[%s1307_s8 + $0x8] sm:$0xff] %vm407_vm2, %v511_v35  ;;  %838 = vst.msk [vmem:[%s1302_s24 + $0x10] sm:$0xff] %vm407_vm2, %v416_v36 }
 0x1ae   : > { %v521_v37 = vpop.permute.xlu1 %520  ;;  %v516_v38 = vpop.permute.xlu0 %515 }
 0x1af   : > { %845 = vst.msk [vmem:[%s1307_s8 + $0x18] sm:$0xff] %vm407_vm2, %v521_v37  ;;  %844 = vst.msk [vmem:[%s1307_s8 + $0x10] sm:$0xff] %vm407_vm2, %v516_v38 }
 0x1b2   : > { %v616_v39 = vpop.permute.xlu1 %615  ;;  %v611_v40 = vpop.permute.xlu0 %610 }
 0x1b3   : > { %850 = vst.msk [vmem:[%s320_s18 + $0x10] sm:$0xff] %vm407_vm2, %v616_v39  ;;  %849 = vst.msk [vmem:[%s320_s18 + $0x8] sm:$0xff] %vm407_vm2, %v611_v40 }
 0x1b6   : > { %v621_v41 = vpop.permute.xlu0 %620 }
 0x1b7   : > { %851 = vst.msk [vmem:[%s320_s18 + $0x18] sm:$0xff] %vm407_vm2, %v621_v41 }
 0x1b8 PF: > { %s20_s23 = sadd.s32 1, %s1109_s23   ;;  %s1371_s18 = smov %s1093_s19 }
 0x1b9   : > { %p17_p1 = scmp.ge.s32.totalorder %s20_s23, 4   ;;  %s1372_s19 = smov %s1097_s20 }
 0x1ba   : > { %s1373_s20 = smov %s1234_s10  ;;  %s1374_s21 = smov %s1105_s22 }
 0x1bb   : > { %s1375_s22 = smov %s1377_s6  ;;  %19 = sbr.rel (!%p17_p1) target bundleno = 5 (0x5), region = 113 }
 0x1c2   :  { %696 = vsyncpa [#allocation3], 1 }
 0x1c3   :  { %698 = vsyncpa [#allocation3 + $0x1], 1 }
 0x1c4   :  { %699 = vsyncpa [#allocation5], 1 }

// kernel: self_attention.4
= control target key start
LH: loop header
LB: loop body
LE: loop exit
PB: predicated region body
PF: predicated region fallthrough
CT: control target
= control target key end

     0   :  { %s741_s12 = smov 0   ;;  %s743_s13 = smov 0   ;;  %s810_s0 = inlined_call_operand.vmem [shape: f32[2,4,8,8], index: 0, kind: input, shape index: {}]   ;;  %s811_s1 = inlined_call_operand.vmem [shape: f32[2,4,8,8], index: 1, kind: input, shape index: {}]   ;;  %s812_s2 = inlined_call_operand.vmem [shape: f32[2,4,8,8], index: 2, kind: input, shape index: {}]   ;;  %s813_s3 = inlined_call_operand.vmem [shape: f32[2,4,8,8], index: 3, kind: output, shape index: {}]  }
   0x1   :  { %s745_s14 = smov 0   ;;  %s747_s15 = smov 0  }
   0x2   :  { %s749_s16 = smov 0  }
   0x3 LB: > { %s28_s17 = sadd.s32 1, %s709_s14  ;;  %s32_s18 = sadd.s32 1, %s713_s15  ;;  %s717_s16 = sphi %s749_s16, %s13_s16   ;;  %s713_s15 = sphi %s747_s15, %s817_s15   ;;  %s709_s14 = sphi %s745_s14, %s816_s14   ;;  %s705_s13 = sphi %s743_s13, %s815_s13   ;;  %s701_s12 = sphi %s741_s12, %s814_s12  }
   0x4   : > { %p30_p0 = scmp.ge.s32.totalorder %s28_s17, 4  ;;  %p603_p1 = scmp.ge.s32.totalorder %s717_s16, 1 }
   0x5   : > { %p200_p2 = scmp.lt.s32.totalorder %s717_s16, 9 }
   0x6   : > { %s819_s17 = smov (%p30_p0, %s28_s17), 0  ;;  %s821_s18 = smov (!%p30_p0, %s32_s18), %s713_s15 }
   0x7   : > { %p201_p3 = pnand %p603_p1, %p200_p2  ;;  %p34_p4 = scmp.ge.s32.totalorder %s821_s18, 2 }
   0x8   : > { %p252_p5 = scmp.lt.s32.totalorder (!%p201_p3), %s705_s13, 1  ;;  %p254_p6 = scmp.lt.s32.totalorder (!%p201_p3), %s701_s12, 3  ;;  %v719_v0 = vmov (!%p201_p3), 0.0   ;;  %vm720_vm0 = vmmov (!%p201_p3), 0   ;;  %vm293_vm1 = vcmask (!%p201_p3), 64512  }
   0x9   : > { %s823_s18 = smov (%p34_p4, %s821_s18), 0  ;;  %204 = sbr.rel (%p201_p3) target bundleno = 612 (0x264), region = 32 }
   0xa   : > { %621 = vmatprep.subr.mxu0 (!%p201_p3), %v719_v0  ;;  %623 = vmatprep.mubr.msk.f32.mxu0 (!%p201_p3), %vm720_vm0, %v719_v0 }
   0xb   : > { %626 = vmatprep.subr.mxu1 (!%p201_p3), %v719_v0  ;;  %628 = vmatprep.mubr.msk.f32.mxu1 (!%p201_p3), %vm720_vm0, %v719_v0 }
  0x10   : > { %s825_s13 = smov (!%p252_p5, %s705_s13), 1  ;;  %s827_s12 = smov (!%p254_p6, %s701_s12), 3 }
  0x11   : > { %s604_s19 = sshll.u32 %s825_s13, 2 }
  0x12   : > { %s260_s20 = sadd.s32 %s604_s19, %s827_s12 }
  0x13   : > { %s771_s21 = sshll.u32 %s260_s20, 3 }
  0x14   : > { %s270_s24 = scalar_lea.vmem %s811_s1, %s771_s21  ;;  %s262_s27 = scalar_lea.vmem %s810_s0, %s771_s21 }
  0x15   : > { %v291_v1 = vld [vmem:[%s270_s24] sm:$0xff]  ;;  %s278_s30 = scalar_lea.vmem %s812_s2, %s771_s21  ;;  %s289_s6 = scalar_lea.vmem %s813_s3, %s771_s21 }
  0x16   : > { %622 = vmatpush3.xpose.msk.msra.mxu0 %vm293_vm1, %v291_v1  ;;  %v290_v2 = vld [vmem:[%s262_s27] sm:$0xff] }
  0x17   : > { %v292_v6 = vld [vmem:[%s278_s30] sm:$0xff] }
  0x18   : > { %627 = vmatpush3.msra.mxu1 %v292_v6 }
  0x19   : > { %624 = vmatmul.mubr.msk.f32.vlgmr.msra.gmra.mrb[0].mxu0 %vm293_vm1, %v290_v2 }
  0xec   : > { %v366_v3 = vpop.f32.mrb[0].mxu0 }
  0xed   : > { %v625_v4 = vpop.f32.mrb[1].mxu0  ;;  %v370_v5 = vsel %vm293_vm1, %v366_v3, -inf }
  0xee   : > { %371 = vmax.xlane.f32.xlu0 %v370_v5 }
 0x17b   : > { %v372_v7 = vpop.xlane.xlu0 %371 }
 0x17c   : > { %v376_v8 = vsub.f32 %v366_v3, %v372_v7  ;;  %v373_v12 = vsub.f32 -inf, %v372_v7 }
 0x17e   : > { %v377_v9 = vmul.f32 1.442695, %v376_v8  ;;  %v374_v13 = vmul.f32 1.442695, %v373_v12 }
 0x180   : > { %673 = vpow2.f32 %v377_v9 }
 0x181   : > { %675 = vpow2.f32 %v374_v13 }
 0x18a   : > { %v674_v10 = vpop.eup %673 }
 0x18b   : > { %629 = vmatmul.mubr.msk.f32.vlgmr.msra.gmra.mrb[0].mxu1 %vm293_vm1, %v674_v10  ;;  %v380_v11 = vsel %vm293_vm1, %v674_v10, 0.0  ;;  %v676_v14 = vpop.eup %675 }
 0x18c   : > { %381 = vadd.xlane.f32.xlu0 %v380_v11  ;;  %v379_v16 = vmul.f32 0.0, %v676_v14 }
 0x219   : > { %v382_v15 = vpop.xlane.xlu0 %381 }
 0x21a   : > { %v383_v17 = vadd.f32 %v382_v15, %v379_v16 }
 0x21c   : > { %677 = vrcp.f32 %v383_v17 }
 0x226   : > { %v678_v21 = vpop.eup %677 }
 0x25e   : > { %v453_v18 = vpop.f32.mrb[0].mxu1 }
 0x25f   : > { %v457_v19 = vadd.f32 %v453_v18, %v379_v16  ;;  %v630_v20 = vpop.f32.mrb[1].mxu1 }
 0x261   : > { %v459_v22 = vmul.f32 %v678_v21, %v457_v19 }
 0x263   : > { %460 = vst.msk [vmem:[%s289_s6] sm:$0xff] %vm293_vm1, %v459_v22 }
 0x264 PF: > { %s13_s16 = sadd.s32 1, %s717_s16   ;;  %s814_s12 = smov %s709_s14 }
 0x265   : > { %p10_p7 = scmp.ge.s32.totalorder %s13_s16, 10   ;;  %s815_s13 = smov %s713_s15 }
 0x266   : > { %s816_s14 = smov %s819_s17  ;;  %s817_s15 = smov %s823_s18 }
 0x267   :  { %12 = sbr.rel (!%p10_p7) target bundleno = 3 (0x3), region = 68 }

// kernel: self_attention.5
= control target key start
LH: loop header
LB: loop body
LE: loop exit
PB: predicated region body
PF: predicated region fallthrough
CT: control target
= control target key end

     0   :  { %8 = vsyncpa [#allocation3], 0  ;;  %s949_s0 = inlined_call_operand.vmem [shape: f32[2,4,8,8], index: 0, kind: input, shape index: {}]   ;;  %s950_s1 = inlined_call_operand.vmem [shape: f32[4,8,32], index: 1, kind: input, shape index: {}]   ;;  %s951_s2 = inlined_call_operand.vmem [shape: f32[1,32], index: 2, kind: input, shape index: {}]   ;;  %s952_s3 = inlined_call_operand.hbm [shape: f32[2,8,32], index: 3, kind: output, shape index: {}]  }
   0x1   :  { %10 = vsyncpa [#allocation3 + $0x1], 0  ;;  %s814_s12 = smov 0   ;;  %s816_s13 = smov 0  }
   0x2   :  { %s818_s14 = smov 0   ;;  %s820_s15 = smov 0  }
   0x3   :  { %s822_s16 = smov 0   ;;  %s824_s17 = smov 0  }
   0x4 LB: > { %s602_s18 = sadd.s32 4294967295, %s789_s17   ;;  %s603_s19 = sadd.s32 4294967294, %s789_s17   ;;  %s789_s17 = sphi %s824_s17, %s16_s17   ;;  %s785_s16 = sphi %s822_s16, %s959_s16   ;;  %s781_s15 = sphi %s820_s15, %s958_s15   ;;  %s777_s14 = sphi %s818_s14, %s957_s14   ;;  %s773_s13 = sphi %s816_s13, %s956_s13   ;;  %s769_s12 = sphi %s814_s12, %s955_s12  }
   0x5   : > { %s28_s20 = sadd.s32 1, %s785_s16  ;;  %s107_s21 = sadd.s32 1, %s777_s14 }
   0x6   : > { %p30_p0 = scmp.ge.s32.totalorder %s28_s20, 2  ;;  %p117_p1 = scmp.ne.s32.totalorder %s777_s14, %s773_s13 }
   0x7   : > { %p118_p2 = scmp.eq.s32.totalorder %s602_s18, 1  ;;  %p123_p3 = scmp.ne.s32.totalorder %s773_s13, %s769_s12 }
   0x8   : > { %s961_s20 = smov (%p30_p0, %s28_s20), 0  ;;  %p124_p5 = scmp.eq.s32.totalorder %s603_s19, 1 }
   0x9   : > { %p854_p4 = por %p118_p2, %p117_p1  ;;  %s102_s23 = ssub.s32 %s785_s16, %s961_s20 }
   0xa   : > { %p606_p6 = scmp.ge.s32.totalorder %s789_s17, 1  ;;  %p105_p7 = scmp.eq.s32.totalorder %s102_s23, 0 }
   0xb   : > { %p861_p8 = por %p124_p5, %p123_p3  ;;  %p159_p9 = scmp.lt.s32.totalorder %s789_s17, 3 }
   0xc   : > { %s867_s25 = scalar_select %p105_p7, %s777_s14, %s107_s21  }
   0xd   : > { %p160_p10 = pnand %p606_p6, %p159_p9 }
   0xe   : > { %v611_v0 = vld [vmem:[%s950_s1 + $0x8] sm:$0xff] (!%p160_p10)  ;;  %v195_v1 = vld [vmem:[%s950_s1] sm:$0xff] (!%p160_p10)  ;;  %p186_p11 = scmp.lt.s32.totalorder (!%p160_p10), %s781_s15, 1  ;;  %v791_v2 = vmov (!%p160_p10), 0.0   ;;  %vm792_vm0 = vmmov (!%p160_p10), 0   ;;  %vm200_vm1 = vcmask (!%p160_p10), 64512  }
   0xf   : > { %163 = sbr.rel (%p160_p10) target bundleno = 263 (0x107), region = 32  ;;  %634 = vmatprep.subr.mxu0 (!%p160_p10), %v791_v2  ;;  %639 = vmatprep.subr.mxu1 (!%p160_p10), %v791_v2  ;;  %v615_v3 = vld [vmem:[%s950_s1 + $0x10] sm:$0xff] (!%p160_p10)  ;;  %v618_v4 = vld [vmem:[%s950_s1 + $0x18] sm:$0xff] (!%p160_p10)  ;;  %s183_s18 = sand.u32 (!%p160_p10), 1, %s773_s13   ;;  %v620_v19 = vld [vmem:[%s951_s2] ss:$0 sm:$0xff] (!%p160_p10) }
  0x10   : > { %635 = vmatpush3.msra.mxu0 (!%p160_p10), %v611_v0  ;;  %636 = vmatprep.mubr.msk.f32.mxu0 (!%p160_p10), %vm792_vm0, %v791_v2  ;;  %s607_s19 = sshll.u32 (!%p160_p10), %s183_s18, 3  ;;  %s622_s26 = sshll.u32 (!%p160_p10), %s781_s15, 7  ;;  %vm511_vm2 = vcmask (!%p160_p10), 261120  }
  0x11   : > { %640 = vmatpush3.msra.mxu1 (!%p160_p10), %v195_v1  ;;  %641 = vmatprep.mubr.msk.f32.mxu1 (!%p160_p10), %vm792_vm0, %v791_v2  ;;  %s185_s27 = scalar_lea.vmem (!%p160_p10), [#allocation2], %s607_s19  ;;  %s514_s5 = scalar_lea.sflag (!%p160_p10), [#allocation3], %s183_s18 }
  0x12   : > { %644 = vmatprep.subr.mxu0 (!%p160_p10), %v791_v2  ;;  %649 = vmatprep.subr.mxu1 (!%p160_p10), %v791_v2  ;;  %s528_s28 = sshll.u32 (!%p160_p10), %s185_s27, 4  ;;  %s904_s28 = int_to_ptr.vmem [resolvable:$true] %s528_s28 }
  0x13   : > { %s711_s6 = scalar_lea.vmem (!%p160_p10), %s904_s28, 128 }
  0x14   : > { %p712_p12 = scmp.ne.s32.totalorder (!%p160_p10), %s904_s28, %s711_s6 }
  0x16   : > { %s187_s30 = scalar_select %p186_p11, %s781_s15, 1 }
  0x17   : > { %p713_p13 = pnand %p712_p12, %p854_p4  ;;  %s793_s15 = smov [#allocation2]  }
  0x18   : > { %s625_s4 = sshll.u32 %s187_s30, 5 }
  0x19   : > { %s193_s7 = scalar_lea.vmem %s949_s0, %s625_s4  ;;  %s902_s4 = scalar_lea.hbm %s952_s3, %s622_s26 }
  0x1a   : > { %v610_v5 = vld [vmem:[%s193_s7 + $0x8] sm:$0xff]  ;;  %v194_v6 = vld [vmem:[%s193_s7] sm:$0xff]  ;;  %v614_v7 = vld [vmem:[%s193_s7 + $0x10] sm:$0xff]  ;;  %p714_p0 = pneg %p713_p13 }
  0x1b   : > { %637 = vmatmul.mubr.msk.f32.vlgmr.msra.gmra.mrb[0].mxu0 %vm200_vm1, %v610_v5  ;;  %642 = vmatmul.mubr.msk.f32.vlgmr.msra.gmra.mrb[0].mxu1 %vm200_vm1, %v194_v6  ;;  %v617_v8 = vld [vmem:[%s193_s7 + $0x18] sm:$0xff]  ;;  %s715_s7 = sshll.u32 %s793_s15, 4  ;;  %s716_s7 = int_to_ptr.vmem [resolvable:$false] %s715_s7 }
  0x1c   : > { %645 = vmatpush3.msra.mxu0 %v615_v3  ;;  %650 = vmatpush3.msra.mxu1 %v618_v4  ;;  %s717_s8 = scalar_lea.vmem %s716_s7, 256  ;;  %p718_p1 = scmp.lt.s32.totalorder %s904_s28, %s716_s7 }
  0x1d   : > { %646 = vmatprep.mubr.msk.f32.mxu0 %vm792_vm0, %v791_v2  ;;  %651 = vmatprep.mubr.msk.f32.mxu1 %vm792_vm0, %v791_v2  ;;  %p719_p2 = scmp.lt.s32.totalorder %s717_s8, %s711_s6 }
  0x1f   : > { %647 = vmatmul.mubr.msk.f32.vlgmr.msra.gmra.mrb[2].mxu0 %vm200_vm1, %v614_v7  ;;  %652 = vmatmul.mubr.msk.f32.vlgmr.msra.gmra.mrb[2].mxu1 %vm200_vm1, %v617_v8  ;;  %p720_p3 = por %p719_p2, %p718_p1 }
  0x21   : > { %p721_p5 = pnand %p720_p3, %p714_p0 }
  0xee   : > { %v270_v9 = vpop.f32.mrb[0].mxu0  ;;  %v343_v10 = vpop.f32.mrb[0].mxu1 }
  0xef   : > { %v344_v11 = vadd.f32 %v343_v10, %v270_v9  ;;  %v638_v12 = vpop.f32.mrb[1].mxu0  ;;  %v643_v13 = vpop.f32.mrb[1].mxu1 }
  0xf2   : > { %v420_v14 = vpop.f32.mrb[2].mxu0  ;;  %v498_v15 = vpop.f32.mrb[2].mxu1 }
  0xf3   : > { %v424_v16 = vadd.f32 %v420_v14, %v344_v11  ;;  %v648_v17 = vpop.f32.mrb[3].mxu0  ;;  %v653_v18 = vpop.f32.mrb[3].mxu1 }
  0xf5   : > { %v502_v20 = vadd.f32 %v498_v15, %v424_v16 }
  0xf7   : > { %v510_v21 = vadd.f32 %v620_v19, %v502_v20 }
  0xf9   : > { %512 = vst.msk [vmem:[%s185_s27] sm:$0xff] %vm511_vm2, %v510_v21 }
  0xfa   : > { %724 = shalt.err (!%p721_p5)
}
  0xfb   : > { %s725_s9 = scalar_lea.hbm %s902_s4, 128  ;;  %s729_s18 = scalar_lea.hbm %s952_s3, 256 }
  0xfc   : > { %p726_p6 = scmp.ne.s32.totalorder %s902_s4, %s725_s9  ;;  %p730_p10 = scmp.lt.u32.totalorder %s902_s4, %s952_s3 }
  0xfd   : > { %p731_p11 = scmp.lt.u32.totalorder %s729_s18, %s725_s9  ;;  %p733_p13 = scmp.lt.u32.totalorder %s725_s9, %s902_s4 }
  0xfe   : > { %p727_p7 = pnand %p726_p6, %p854_p4 }
  0xff   : > { %p732_p12 = por %p731_p11, %p730_p10 }
 0x100   : > { %p728_p9 = pneg %p727_p7 }
 0x101   : > { %p734_p0 = por %p733_p13, %p732_p12 }
 0x103   : > { %p735_p1 = pnand %p734_p0, %p728_p9 }
 0x105   : > { %738 = shalt.err (!%p735_p1)
}
 0x106   : > { %654 = dma.vmem_to_hbm [thread:$0]  (%p854_p4), %s904_s28, 128, %s902_s4, %s514_s5  }
 0x107 PF: > { %p660_p2 = scmp.ge.s32.totalorder %s789_s17, 2  ;;  %s540_s23 = sand.u32 1, %s769_s12  }
 0x108   : > { %s541_s26 = scalar_lea.sflag [#allocation3], %s540_s23 }
 0x109   : > { %p657_p3 = pnand %p660_p2, %p861_p8 }
 0x10b   : > { %764 = dma.done.wait (!%p657_p3), %s541_s26, 128  }
 0x10c   : > { %766 = vsyncadd (!%p657_p3), %s541_s26, 4294967168  ;;  %s16_s17 = sadd.s32 1, %s789_s17   ;;  %s955_s12 = smov %s773_s13 }
 0x10d   : > { %p13_p5 = scmp.ge.s32.totalorder %s16_s17, 4   ;;  %s956_s13 = smov %s777_s14 }
 0x10e   : > { %s957_s14 = smov %s867_s25  ;;  %s958_s15 = smov %s785_s16 }
 0x10f   : > { %s959_s16 = smov %s961_s20  ;;  %15 = sbr.rel (!%p13_p5) target bundleno = 4 (0x4), region = 73 }
 0x116   :  { %546 = vsyncpa [#allocation3], 1 }
 0x117   :  { %548 = vsyncpa [#allocation3 + $0x1], 1 }

</bundles_post_ra>
